<compile_context>
chip_gen: v6e
topology: v6e:2x2x1
jax: 0.10.0
libtpu: 0.0.40
codegen_flags: <defaults>
</compile_context>

<pallas_src>
import functools

import jax
import jax.numpy as jnp
from jax.experimental import pallas as pl
from jax.experimental.pallas import tpu as pltpu


def _cdiv(a, b):
    return -(-a // b)


def _round_up(x, m):
    return _cdiv(x, m) * m


def _choose_row_tiling(n, max_tile_rows):
    """Pick (tile_rows, num_tiles) for the flattened token axis.

    - tile_rows is a multiple of 8 (sublane quantum) and <= max_tile_rows,
      computed as round_up(cdiv(n, k), 8) so row padding is only a few rows.
    - once n >= 512 we force >= 2 tiles (and an even count) so the "parallel"
      grid axis splits across v7x's two TensorCores and pipelining has work.
    """
    num_tiles = max(1, _cdiv(n, max_tile_rows))
    if n >= 512:
        num_tiles = max(num_tiles, 2)
    if num_tiles > 1 and num_tiles % 2:
        num_tiles += 1
    tile_rows = max(8, _round_up(_cdiv(n, num_tiles), 8))
    return tile_rows, num_tiles


def _bigram_loss_kernel(idx_ref, tgt_ref, emb_ref, logits_ref, rowloss_ref,
                        *, valid_n):
    """One tile: (TN,1) ids/targets + resident (Vp,Vp) table -> logits + row CE.

    Padded vocab lanes of the table carry -1e30, so the straight logsumexp over
    the padded row is already correct (exp underflows to exactly 0).  Padded
    rows (global row >= valid_n) get rowloss = 0 so the wrapper can sum
    without slicing.
    """
    tn, vp = logits_ref.shape
    ids = idx_ref[...]                                        # (TN, 1) int32
    col = jax.lax.broadcasted_iota(jnp.int32, (tn, vp), 1)    # (TN, Vp)

    # one-hot(idx) @ table == row gather on the MXU; precision pinned so the
    # gather is exact to f32 rounding on every chip generation.
    onehot = (col == ids).astype(jnp.float32)                 # (TN, Vp)
    logits = jnp.dot(onehot, emb_ref[...],
                     preferred_element_type=jnp.float32,
                     precision=jax.lax.Precision.HIGHEST)     # (TN, Vp)
    logits_ref[...] = logits

    # Per-row cross entropy: logsumexp(logits) - logits[target].
    m = jnp.max(logits, axis=-1, keepdims=True)               # (TN, 1)
    lse = m + jnp.log(jnp.sum(jnp.exp(logits - m), axis=-1, keepdims=True))
    # No float one-hot / extra multiply: select-then-reduce (targets < V so a
    # valid lane is always picked).
    correct = jnp.sum(jnp.where(col == tgt_ref[...], logits, 0.0),
                      axis=-1, keepdims=True)                 # (TN, 1)

    # Zero padded rows in-kernel so the wrapper reduction needs no slice.
    row = (jax.lax.broadcasted_iota(jnp.int32, (tn, 1), 0)
           + pl.program_id(0) * tn)
    rowloss_ref[...] = jnp.where(row < valid_n, lse - correct, 0.0)


def _bigram_logits_kernel(idx_ref, emb_ref, logits_ref):
    """Inference path: embedding lookup only, no cross-entropy work."""
    tn, vp = logits_ref.shape
    ids = idx_ref[...]
    col = jax.lax.broadcasted_iota(jnp.int32, (tn, vp), 1)
    onehot = (col == ids).astype(jnp.float32)
    logits_ref[...] = jnp.dot(onehot, emb_ref[...],
                              preferred_element_type=jnp.float32,
                              precision=jax.lax.Precision.HIGHEST)


@functools.partial(jax.jit, static_argnames=("max_tile_rows",
                                              "pad_vocab_output"))
def bigram_forward(idx, embedding, targets=None, *,
                   max_tile_rows=2048, pad_vocab_output=False):
    """Mirrors BigramLM.forward.

    idx:       (B, T) int token ids
    embedding: (V, V) float32 (nn.Embedding weight)
    targets:   optional (B, T) int token ids
    max_tile_rows: row-tile cap (2048 is a good v5e/v6e default; use
                   4096-8192 on v7x for large N).
    pad_vocab_output: if True, return the lane-dense padded logits (Np, Vp)
                   straight from the kernel (no extra HBM round-trip).  Valid
                   region is [:B*T, :V]; padded vocab lanes hold -1e30
                   (softmax-safe), padded rows are garbage.

    Returns (logits, loss):
      - targets given: logits (B*T, V), loss scalar
      - targets None:  logits (B, T, V), loss None
      (padded shapes instead when pad_vocab_output=True)
    """
    B, T = idx.shape
    V = embedding.shape[0]
    N = B * T

    # Lane-dense vocab padding and row tiling.
    Vp = _round_up(V, 128)
    TN, num_tiles = _choose_row_tiling(N, max_tile_rows)
    Np = num_tiles * TN

    # Padded table with the vocab-pad mask baked in: pad columns are -1e30 so
    # the one-hot matmul already produces "masked" logits in padded lanes.
    emb_p = jnp.full((Vp, Vp), 0.0, jnp.float32)
    emb_p = emb_p.at[:, V:].set(jnp.float32(-1e30))
    emb_p = emb_p.at[:V, :V].set(embedding.astype(jnp.float32))

    idx_flat = jnp.zeros((Np, 1), jnp.int32).at[:N, 0].set(
        idx.reshape(-1).astype(jnp.int32))

    grid = (num_tiles,)
    idx_spec = pl.BlockSpec((TN, 1), lambda i: (i, 0))
    tgt_spec = pl.BlockSpec((TN, 1), lambda i: (i, 0))
    emb_spec = pl.BlockSpec((Vp, Vp), lambda i: (0, 0))      # resident table
    logits_spec = pl.BlockSpec((TN, Vp), lambda i: (i, 0))
    rowloss_spec = pl.BlockSpec((TN, 1), lambda i: (i, 0))
    cparams = pltpu.CompilerParams(dimension_semantics=("parallel",))

    if targets is None:
        logits_p = pl.pallas_call(
            _bigram_logits_kernel,
            grid=grid,
            in_specs=[idx_spec, emb_spec],
            out_specs=logits_spec,
            out_shape=jax.ShapeDtypeStruct((Np, Vp), jnp.float32),
            compiler_params=cparams,
        )(idx_flat, emb_p)
        if pad_vocab_output:
            return logits_p, None
        return logits_p[:N, :V].reshape(B, T, V), None

    tgt_flat = jnp.zeros((Np, 1), jnp.int32).at[:N, 0].set(
        targets.reshape(-1).astype(jnp.int32))

    logits_p, rowloss = pl.pallas_call(
        functools.partial(_bigram_loss_kernel, valid_n=N),
        grid=grid,
        in_specs=[idx_spec, tgt_spec, emb_spec],
        out_specs=(logits_spec, rowloss_spec),
        out_shape=(
            jax.ShapeDtypeStruct((Np, Vp), jnp.float32),
            jax.ShapeDtypeStruct((Np, 1), jnp.float32),
        ),
        compiler_params=cparams,
    )(idx_flat, tgt_flat, emb_p)

    # Padded rows are already zeroed in-kernel -> plain sum, no slicing.
    loss = jnp.sum(rowloss) / N
    if pad_vocab_output:
        return logits_p, loss
    return logits_p[:N, :V], loss


def _reference(idx, embedding, targets):
    """Pure-JAX reference of the PyTorch forward (with targets)."""
    ref_logits = embedding[idx.reshape(-1)]
    lse = jax.scipy.special.logsumexp(ref_logits, axis=-1)
    picked = jnp.take_along_axis(ref_logits, targets.reshape(-1, 1), axis=-1)[:, 0]
    return ref_logits, jnp.mean(lse - picked)


if __name__ == "__main__":
    key = jax.random.PRNGKey(0)
    k_emb, k_idx, k_tgt, k_idx2, k_tgt2 = jax.random.split(key, 5)

    vocab_size = 65   # e.g. a char-level vocab
    batch, seq = 2, 8

    # nn.Embedding(vocabSize, vocabSize) weight, deterministic init
    embedding = jax.random.normal(k_emb, (vocab_size, vocab_size), jnp.float32)
    idx = jax.random.randint(k_idx, (batch, seq), 0, vocab_size, jnp.int32)
    targets = jax.random.randint(k_tgt, (batch, seq), 0, vocab_size, jnp.int32)

    # --- with targets: logits (B*T, V), scalar loss -------------------------
    logits, loss = bigram_forward(idx, embedding, targets)
    jax.block_until_ready((logits, loss))

    ref_logits, ref_loss = _reference(idx, embedding, targets)
    assert logits.shape == (batch * seq, vocab_size)
    assert jnp.allclose(logits, ref_logits, atol=1e-5)
    assert jnp.allclose(loss, ref_loss, atol=1e-4, rtol=1e-5)

    # --- padded fast path: lane-dense logits straight from the kernel -------
    logits_pad, loss_pad = bigram_forward(idx, embedding, targets,
                                          pad_vocab_output=True)
    jax.block_until_ready((logits_pad, loss_pad))
    assert logits_pad.shape[1] % 128 == 0
    assert jnp.allclose(logits_pad[:batch * seq, :vocab_size], ref_logits,
                        atol=1e-5)
    assert jnp.allclose(loss_pad, ref_loss, atol=1e-4, rtol=1e-5)

    # --- without targets: logits (B, T, V), loss None -----------------------
    logits_nt, loss_nt = bigram_forward(idx, embedding)
    jax.block_until_ready(logits_nt)
    assert logits_nt.shape == (batch, seq, vocab_size)
    assert loss_nt is None
    assert jnp.allclose(logits_nt.reshape(-1, vocab_size), ref_logits, atol=1e-5)

    # --- a multi-tile case (2 even tiles, row padding, megacore split) ------
    b2, t2 = 3, 200                       # N = 600 -> 2 tiles of 304 rows
    idx2 = jax.random.randint(k_idx2, (b2, t2), 0, vocab_size, jnp.int32)
    tgt2 = jax.random.randint(k_tgt2, (b2, t2), 0, vocab_size, jnp.int32)
    logits2, loss2 = bigram_forward(idx2, embedding, tgt2)
    jax.block_until_ready((logits2, loss2))
    ref_logits2, ref_loss2 = _reference(idx2, embedding, tgt2)
    assert logits2.shape == (b2 * t2, vocab_size)
    assert jnp.allclose(logits2, ref_logits2, atol=1e-5)
    assert jnp.allclose(loss2, ref_loss2, atol=1e-4, rtol=1e-5)

    # TODO(synk): generate() uses torch.multinomial autoregressive sampling
    # (stateful RNG loop); not implemented as a kernel — the forward hot path
    # above is what matters.
    print("KERNEL_OK")
</pallas_src>

<mosaic_0001>
module attributes {stable_mosaic.version = 11 : i64} {
  func.func @_bigram_loss_kernel(%arg0: i32, %arg1: memref<16x1xi32, #tpu.memory_space<vmem>>, %arg2: memref<16x1xi32, #tpu.memory_space<vmem>>, %arg3: memref<128x128xf32, #tpu.memory_space<vmem>>, %arg4: memref<16x128xf32, #tpu.memory_space<vmem>>, %arg5: memref<16x1xf32, #tpu.memory_space<vmem>>) attributes {dimension_semantics = [#tpu.dimension_semantics<parallel>], iteration_bounds = array<i64: 1>, scalar_prefetch = 0 : i64, scratch_operands = 0 : i64, tpu.core_type = #tpu.core_type<tc>, window_params = [{transform_indices = @transform_0, window_bounds = array<i64: 16, 1>}, {transform_indices = @transform_1, window_bounds = array<i64: 16, 1>}, {pipeline_mode = #tpu.pipeline_mode<synchronous>, transform_indices = @transform_2, window_bounds = array<i64: 128, 128>}, {transform_indices = @transform_3, window_bounds = array<i64: 16, 128>}, {transform_indices = @transform_4, window_bounds = array<i64: 16, 1>}]} {
    %c0 = arith.constant 0 : index
    %c0_0 = arith.constant 0 : index
    %0 = vector.load %arg1[%c0, %c0_0] : memref<16x1xi32, #tpu.memory_space<vmem>>, vector<16x1xi32>
    %1 = tpu.iota {dimensions = array<i32: 1>} : vector<16x128xi32>
    %2 = vector.broadcast %0 : vector<16x1xi32> to vector<16x128xi32>
    %3 = arith.cmpi eq, %1, %2 : vector<16x128xi32>
    %4 = arith.extui %3 : vector<16x128xi1> to vector<16x128xi32>
    %5 = arith.sitofp %4 : vector<16x128xi32> to vector<16x128xf32>
    %c0_1 = arith.constant 0 : index
    %c0_2 = arith.constant 0 : index
    %6 = vector.load %arg3[%c0_1, %c0_2] : memref<128x128xf32, #tpu.memory_space<vmem>>, vector<128x128xf32>
    %cst = arith.constant dense<0.000000e+00> : vector<16x128xf32>
    %7 = tpu.matmul %5, %6, %cst {dimension_numbers = #tpu.dot_dimension_numbers<[1], [0], [0], [1], [0, 0, 1, 1], [], []>, precision = #tpu.contract_precision<fp32>} : vector<16x128xf32>, vector<128x128xf32>, vector<16x128xf32> -> vector<16x128xf32>
    %c0_3 = arith.constant 0 : index
    %c0_4 = arith.constant 0 : index
    %8 = vector.load %arg4[%c0_3, %c0_4] : memref<16x128xf32, #tpu.memory_space<vmem>>, vector<16x128xf32>
    tpu.vector_store %arg4[%c0_3, %c0_4], %7 {strides = array<i32>} : memref<16x128xf32, #tpu.memory_space<vmem>>, vector<16x128xf32>,
    %cst_5 = arith.constant dense<0xFF800000> : vector<16xf32>
    %9 = vector.multi_reduction <maximumf>, %7, %cst_5 [1] : vector<16x128xf32> to vector<16xf32>
    %10 = vector.shape_cast %9 : vector<16xf32> to vector<16x1xf32>
    %11 = vector.broadcast %10 : vector<16x1xf32> to vector<16x128xf32>
    %12 = arith.subf %7, %11 : vector<16x128xf32>
    %13 = math.exp %12 : vector<16x128xf32>
    %cst_6 = arith.constant dense<0.000000e+00> : vector<16xf32>
    %14 = vector.multi_reduction <add>, %13, %cst_6 [1] : vector<16x128xf32> to vector<16xf32>
    %15 = vector.shape_cast %14 : vector<16xf32> to vector<16x1xf32>
    %16 = math.log %15 : vector<16x1xf32>
    %17 = arith.addf %10, %16 : vector<16x1xf32>
    %c0_7 = arith.constant 0 : index
    %c0_8 = arith.constant 0 : index
    %18 = vector.load %arg2[%c0_7, %c0_8] : memref<16x1xi32, #tpu.memory_space<vmem>>, vector<16x1xi32>
    %19 = vector.broadcast %18 : vector<16x1xi32> to vector<16x128xi32>
    %20 = arith.cmpi eq, %1, %19 : vector<16x128xi32>
    %cst_9 = arith.constant 0.000000e+00 : f32
    %21 = vector.broadcast %cst_9 : f32 to vector<16x128xf32>
    %22 = arith.select %20, %7, %21 : vector<16x128xi1>, vector<16x128xf32>
    %cst_10 = arith.constant dense<0.000000e+00> : vector<16xf32>
    %23 = vector.multi_reduction <add>, %22, %cst_10 [1] : vector<16x128xf32> to vector<16xf32>
    %24 = vector.shape_cast %23 : vector<16xf32> to vector<16x1xf32>
    %25 = tpu.iota {dimensions = array<i32: 0>} : vector<16x1xi32>
    %c16_i32 = arith.constant 16 : i32
    %26 = arith.muli %arg0, %c16_i32 : i32
    %27 = vector.broadcast %26 : i32 to vector<16x1xi32>
    %28 = arith.addi %25, %27 : vector<16x1xi32>
    %c16_i32_11 = arith.constant 16 : i32
    %29 = vector.broadcast %c16_i32_11 : i32 to vector<16x1xi32>
    %30 = arith.cmpi slt, %28, %29 : vector<16x1xi32>
    %31 = arith.subf %17, %24 : vector<16x1xf32>
    %cst_12 = arith.constant 0.000000e+00 : f32
    %32 = vector.broadcast %cst_12 : f32 to vector<16x1xf32>
    %33 = arith.select %30, %31, %32 : vector<16x1xi1>, vector<16x1xf32>
    %c0_13 = arith.constant 0 : index
    %c0_14 = arith.constant 0 : index
    %34 = vector.load %arg5[%c0_13, %c0_14] : memref<16x1xf32, #tpu.memory_space<vmem>>, vector<16x1xf32>
    tpu.vector_store %arg5[%c0_13, %c0_14], %33 {strides = array<i32>} : memref<16x1xf32, #tpu.memory_space<vmem>>, vector<16x1xf32>,
    return
  }
  func.func @transform_0(%arg0: i32) -> (i32, i32) {
    %c0_i32 = arith.constant 0 : i32
    %c0_i32_0 = arith.constant 0 : i32
    return %arg0, %c0_i32 : i32, i32
  }
  func.func @transform_1(%arg0: i32) -> (i32, i32) {
    %c0_i32 = arith.constant 0 : i32
    %c0_i32_0 = arith.constant 0 : i32
    return %arg0, %c0_i32 : i32, i32
  }
  func.func @transform_2(%arg0: i32) -> (i32, i32) {
    %c0_i32 = arith.constant 0 : i32
    %c0_i32_0 = arith.constant 0 : i32
    %c0_i32_1 = arith.constant 0 : i32
    return %c0_i32, %c0_i32_0 : i32, i32
  }
  func.func @transform_3(%arg0: i32) -> (i32, i32) {
    %c0_i32 = arith.constant 0 : i32
    %c0_i32_0 = arith.constant 0 : i32
    return %arg0, %c0_i32 : i32, i32
  }
  func.func @transform_4(%arg0: i32) -> (i32, i32) {
    %c0_i32 = arith.constant 0 : i32
    %c0_i32_0 = arith.constant 0 : i32
    return %arg0, %c0_i32 : i32, i32
  }
}

</mosaic_0001>

<bundles_post_ra>
// kernel: bigram_forward.1
= control target key start
LH: loop header
LB: loop body
LE: loop exit
PB: predicated region body
PF: predicated region fallthrough
CT: control target
= control target key end

     0   :  { %v1171_v1 = vmov 0   ;;  %s1638_s0 = inlined_call_operand.vmem [shape: s32[16,1], index: 0, kind: input, shape index: {}]   ;;  %s1639_s1 = inlined_call_operand.vmem [shape: s32[16,1], index: 1, kind: input, shape index: {}]   ;;  %s1640_s2 = inlined_call_operand.vmem [shape: f32[128,128], index: 2, kind: input, shape index: {}]   ;;  %s1641_s3 = inlined_call_operand.hbm [shape: f32[16,128], index: 3, kind: output, shape index: {0}]   ;;  %s1642_s4 = inlined_call_operand.vmem [shape: f32[16,1], index: 4, kind: output, shape index: {1}]  }
   0x1   :  { %v17_v0 = vld [vmem:[%s1638_s0] sm:$0xff]  ;;  %1139 = vset.pattern.permute.xlu0 %v1171_v1  ;;  %v48_v2 = vld [vmem:[%s1640_s2 + $0x78] sm:$0xff]  ;;  %v47_v3 = vld [vmem:[%s1640_s2 + $0x70] sm:$0xff]  ;;  %1140 = vset.pattern.permute.xlu1 %v1171_v1 }
   0x2   :  { %v46_v4 = vld [vmem:[%s1640_s2 + $0x68] sm:$0xff]  ;;  %22 = vperm.xlu0 %1139, %v17_v0   ;;  %v1214_v5 = vand.u32 4294901760, %v48_v2  ;;  %v1216_v6 = vand.u32 4294901760, %v47_v3  ;;  %v45_v8 = vld [vmem:[%s1640_s2 + $0x60] sm:$0xff]  ;;  %v44_v9 = vld [vmem:[%s1640_s2 + $0x58] sm:$0xff] }
   0x3   :  { %v1218_v7 = vand.u32 4294901760, %v46_v4  ;;  %v43_v10 = vld [vmem:[%s1640_s2 + $0x50] sm:$0xff]  ;;  %v18_v11 = vld [vmem:[%s1638_s0 + $0x8] sm:$0xff]  ;;  %v1232_v12 = vand.u32 4294901760, %v45_v8  ;;  %v1234_v13 = vand.u32 4294901760, %v44_v9  ;;  %v41_v16 = vld [vmem:[%s1640_s2 + $0x40] sm:$0xff] }
   0x4   :  { %v1236_v14 = vand.u32 4294901760, %v43_v10  ;;  %v42_v15 = vld [vmem:[%s1640_s2 + $0x48] sm:$0xff]  ;;  %v1245_v17 = vsub.f32 %v48_v2, %v1214_v5  ;;  %v1248_v18 = vsub.f32 %v47_v3, %v1216_v6  ;;  %923 = vmatprep.subr.mxu0 %v1214_v5  ;;  %v1266_v24 = vand.u32 4294901760, %v41_v16 }
   0x5   :  { %v1251_v19 = vsub.f32 %v46_v4, %v1218_v7  ;;  %v1254_v20 = vand.u32 4294901760, %v42_v15  ;;  %v1257_v21 = vsub.f32 %v45_v8, %v1232_v12  ;;  %v1260_v22 = vsub.f32 %v44_v9, %v1234_v13  ;;  %924 = vmatpush3.msra.mxu0 %v1214_v5 }
   0x6   :  { %v1264_v23 = vsub.f32 %v43_v10, %v1236_v14  ;;  %25 = vperm.xlu0 %1139, %v18_v11   ;;  %v1269_v25 = vand.u32 4294901760, %v1245_v17  ;;  %v1272_v26 = vand.u32 4294901760, %v1248_v18  ;;  %925 = vmatprep.subr.mxu0 %v1216_v6 }
   0x7   :  { %v1275_v27 = vand.u32 4294901760, %v1251_v19 }
   0x8   :  { %10 = vsyncpa [#allocation3], 0  ;;  %v755_v28 = vld [vmem:[%s1639_s1] sm:$0xff]  ;;  %v1282_v29 = vand.u32 4294901760, %v1257_v21  ;;  %v1285_v30 = vand.u32 4294901760, %v1260_v22  ;;  %926 = vmatpush3.msra.mxu0 %v1216_v6  ;;  %v1289_v31 = vsub.f32 %v42_v15, %v1254_v20  ;;  %v154_v32 = vsub.f32 %v1245_v17, %v1269_v25  ;;  %v40_v37 = vld [vmem:[%s1640_s2 + $0x38] sm:$0xff] }
   0x9   :  { %v161_v33 = vsub.f32 %v1248_v18, %v1272_v26  ;;  %v168_v34 = vsub.f32 %v1251_v19, %v1275_v27  ;;  %927 = vmatprep.subr.mxu0 %v1218_v7  ;;  %v1299_v35 = vand.u32 4294901760, %v1264_v23  ;;  %v1303_v36 = vsub.f32 %v41_v16, %v1266_v24  ;;  %v39_v38 = vld [vmem:[%s1640_s2 + $0x30] sm:$0xff]  ;;  %v38_v39 = vld [vmem:[%s1640_s2 + $0x28] sm:$0xff]  ;;  %v37_v45 = vld [vmem:[%s1640_s2 + $0x20] sm:$0xff] }
   0xa   :  { %928 = vmatpush3.msra.mxu0 %v1218_v7  ;;  %758 = vperm.xlu0 %1139, %v755_v28   ;;  %v155_v40 = vand.u32 4294901760, %v154_v32  ;;  %v175_v42 = vsub.f32 %v1257_v21, %v1282_v29  ;;  %v182_v43 = vsub.f32 %v1260_v22, %v1285_v30  ;;  %v1320_v44 = vand.u32 4294901760, %v1289_v31  ;;  %v36_v52 = vld [vmem:[%s1640_s2 + $0x18] sm:$0xff]  ;;  %v35_v58 = vld [vmem:[%s1640_s2 + $0x10] sm:$0xff]  ;;  %v34_v0 = vld [vmem:[%s1640_s2 + $0x8] sm:$0xff] }
   0xb   :  { %v162_v41 = vand.u32 4294901760, %v161_v33  ;;  %929 = vmatprep.subr.mxu0 %v1232_v12  ;;  %v169_v46 = vand.u32 4294901760, %v168_v34  ;;  %v1326_v47 = vand.u32 4294901760, %v40_v37  ;;  %v1329_v48 = vand.u32 4294901760, %v39_v38  ;;  %v33_v9 = vld [vmem:[%s1640_s2] sm:$0xff] }
   0xc   :  { %930 = vmatpush3.msra.mxu0 %v1232_v12  ;;  %958 = vmatprep.subr.mxu1 %v155_v40  ;;  %v1331_v49 = vand.u32 4294901760, %v38_v39  ;;  %v189_v50 = vsub.f32 %v1264_v23, %v1299_v35  ;;  %v1336_v51 = vand.u32 4294901760, %v1303_v36  ;;  %v176_v53 = vand.u32 4294901760, %v175_v42 }
   0xd   :  { %931 = vmatprep.subr.mxu0 %v1234_v13  ;;  %959 = vmatpush3.msra.mxu1 %v155_v40  ;;  %v1343_v54 = vsub.f32 %v40_v37, %v1326_v47  ;;  %v1346_v55 = vsub.f32 %v39_v38, %v1329_v48  ;;  %v1349_v56 = vand.u32 4294901760, %v37_v45  ;;  %v196_v57 = vsub.f32 %v1289_v31, %v1320_v44 }
   0xe   :  { %932 = vmatpush3.msra.mxu0 %v1234_v13  ;;  %960 = vmatprep.subr.mxu1 %v162_v41  ;;  %v183_v59 = vand.u32 4294901760, %v182_v43  ;;  %v1361_v61 = vsub.f32 %v38_v39, %v1331_v49  ;;  %v1364_v62 = vand.u32 4294901760, %v36_v52  ;;  %v203_v63 = vsub.f32 %v1303_v36, %v1336_v51 }
   0xf   :  { %933 = vmatprep.subr.mxu0 %v1236_v14  ;;  %961 = vmatpush3.msra.mxu1 %v162_v41  ;;  %v1358_v60 = vand.u32 4294901760, %v1343_v54  ;;  %v190_v1 = vand.u32 4294901760, %v189_v50  ;;  %v1373_v2 = vand.u32 4294901760, %v1346_v55  ;;  %v1376_v3 = vsub.f32 %v37_v45, %v1349_v56 }
  0x10   :  { %934 = vmatpush3.msra.mxu0 %v1236_v14  ;;  %962 = vmatprep.subr.mxu1 %v169_v46  ;;  %v1379_v4 = vand.u32 4294901760, %v35_v58  ;;  %v197_v8 = vand.u32 4294901760, %v196_v57  ;;  %v1388_v11 = vand.u32 4294901760, %v1361_v61  ;;  %v1391_v15 = vsub.f32 %v36_v52, %v1364_v62 }
  0x11   :  { %935 = vmatprep.subr.mxu0 %v1254_v20  ;;  %963 = vmatpush3.msra.mxu1 %v169_v46  ;;  %v210_v10 = vsub.f32 %v1343_v54, %v1358_v60  ;;  %v1394_v16 = vand.u32 4294901760, %v34_v0  ;;  %v204_v28 = vand.u32 4294901760, %v203_v63  ;;  %v217_v32 = vsub.f32 %v1346_v55, %v1373_v2 }
  0x12   :  { %936 = vmatpush3.msra.mxu0 %v1254_v20  ;;  %964 = vmatprep.subr.mxu1 %v176_v53  ;;  %v1400_v33 = vand.u32 4294901760, %v1376_v3  ;;  %v1403_v34 = vsub.f32 %v35_v58, %v1379_v4  ;;  %v1406_v37 = vand.u32 4294901760, %v33_v9  ;;  %v224_v39 = vsub.f32 %v1361_v61, %v1388_v11 }
  0x13   :  { %937 = vmatprep.subr.mxu0 %v1266_v24  ;;  %965 = vmatpush3.msra.mxu1 %v176_v53  ;;  %v211_v38 = vand.u32 4294901760, %v210_v10  ;;  %v1412_v40 = vand.u32 4294901760, %v1391_v15  ;;  %v1415_v41 = vsub.f32 %v34_v0, %v1394_v16  ;;  %v218_v42 = vand.u32 4294901760, %v217_v32 }
  0x14   :  { %938 = vmatpush3.msra.mxu0 %v1266_v24  ;;  %966 = vmatprep.subr.mxu1 %v183_v59  ;;  %v231_v43 = vsub.f32 %v1376_v3, %v1400_v33  ;;  %v1422_v45 = vand.u32 4294901760, %v1403_v34  ;;  %v1425_v46 = vsub.f32 %v33_v9, %v1406_v37  ;;  %v225_v50 = vand.u32 4294901760, %v224_v39 }
  0x15   :  { %939 = vmatprep.subr.mxu0 %v1326_v47  ;;  %967 = vmatpush3.msra.mxu1 %v183_v59  ;;  %v238_v52 = vsub.f32 %v1391_v15, %v1412_v40  ;;  %v1432_v53 = vand.u32 4294901760, %v1415_v41  ;;  %v1172_v39 = vmov 0.0  }
  0x16   :  { %940 = vmatpush3.msra.mxu0 %v1326_v47  ;;  %968 = vmatprep.subr.mxu1 %v190_v1  ;;  %v232_v57 = vand.u32 4294901760, %v231_v43  ;;  %v245_v58 = vsub.f32 %v1403_v34, %v1422_v45  ;;  %v1439_v59 = vand.u32 4294901760, %v1425_v46  ;;  %v1173_v43 = vmov 1.0  }
  0x17   :  { %941 = vmatprep.subr.mxu0 %v1329_v48  ;;  %969 = vmatpush3.msra.mxu1 %v190_v1  ;;  %v239_v63 = vand.u32 4294901760, %v238_v52  ;;  %v252_v0 = vsub.f32 %v1415_v41, %v1432_v53 }
  0x18   :  { %942 = vmatpush3.msra.mxu0 %v1329_v48  ;;  %970 = vmatprep.subr.mxu1 %v197_v8  ;;  %v246_v1 = vand.u32 4294901760, %v245_v58 }
  0x19   :  { %943 = vmatprep.subr.mxu0 %v1331_v49  ;;  %971 = vmatpush3.msra.mxu1 %v197_v8  ;;  %v259_v8 = vsub.f32 %v1425_v46, %v1439_v59  ;;  %v253_v9 = vand.u32 4294901760, %v252_v0 }
  0x1a   :  { %944 = vmatpush3.msra.mxu0 %v1331_v49  ;;  %972 = vmatprep.subr.mxu1 %v204_v28 }
  0x1b   :  { %945 = vmatprep.subr.mxu0 %v1349_v56  ;;  %973 = vmatpush3.msra.mxu1 %v204_v28  ;;  %v260_v10 = vand.u32 4294901760, %v259_v8  ;;  %v19_v28 = vlaneseq }
  0x1c   :  { %946 = vmatpush3.msra.mxu0 %v1349_v56  ;;  %974 = vmatprep.subr.mxu1 %v211_v38 }
  0x1d   :  { %947 = vmatprep.subr.mxu0 %v1364_v62  ;;  %975 = vmatpush3.msra.mxu1 %v211_v38  ;;  %v1453_v32 = vand.u32 127, %v19_v28 }
  0x1e   :  { %948 = vmatpush3.msra.mxu0 %v1364_v62  ;;  %976 = vmatprep.subr.mxu1 %v218_v42 }
  0x1f   :  { %949 = vmatprep.subr.mxu0 %v1379_v4  ;;  %977 = vmatpush3.msra.mxu1 %v218_v42 }
  0x20   :  { %950 = vmatpush3.msra.mxu0 %v1379_v4  ;;  %978 = vmatprep.subr.mxu1 %v225_v50 }
  0x21   :  { %951 = vmatprep.subr.mxu0 %v1394_v16  ;;  %979 = vmatpush3.msra.mxu1 %v225_v50 }
  0x22   :  { %952 = vmatpush3.msra.mxu0 %v1394_v16  ;;  %980 = vmatprep.subr.mxu1 %v232_v57 }
  0x23   :  { %953 = vmatprep.subr.mxu0 %v1406_v37  ;;  %981 = vmatpush3.msra.mxu1 %v232_v57 }
  0x24   :  { %954 = vmatpush3.msra.mxu0 %v1406_v37  ;;  %982 = vmatprep.subr.mxu1 %v239_v63 }
  0x25   :  { %993 = vmatprep.subr.mxu0 %v1245_v17  ;;  %983 = vmatpush3.msra.mxu1 %v239_v63 }
  0x26   :  { %984 = vmatprep.subr.mxu1 %v246_v1 }
  0x27   :  { %985 = vmatpush3.msra.mxu1 %v246_v1 }
  0x28   :  { %986 = vmatprep.subr.mxu1 %v253_v9 }
  0x29   :  { %987 = vmatpush3.msra.mxu1 %v253_v9 }
  0x2a   :  { %988 = vmatprep.subr.mxu1 %v260_v10 }
  0x2b   :  { %989 = vmatpush3.msra.mxu1 %v260_v10 }
  0x2c   :  { %1028 = vmatprep.subr.mxu1 %v1214_v5 }
  0x7d   :  { %v1455_v38 = vpop.permute.xlu0 %22 }
  0x7e   :  { %vm27_vm0 = vcmp.eq.s32.totalorder %v1453_v32, %v1455_v38 }
  0x7f   :  { %v807_v42 = vsel %vm27_vm0, 1.0, %v1172_v39  ;;  %990 = vmatprep.mubr.msk.f32.mxu1 %vm27_vm0, %v1173_v43 }
  0x80   :  { %v131_v50 = vsub.f32 %v807_v42, %v807_v42 }
  0x81   :  { %v1466_v52 = vpop.permute.xlu0 %25 }
  0x82   :  { %vm28_vm1 = vcmp.eq.s32.totalorder %v1453_v32, %v1466_v52  ;;  %v132_v57 = vand.u32 4294901760, %v131_v50 }
  0x83   :  { %v808_v58 = vsel %vm28_vm1, 1.0, %v1172_v39  ;;  %991 = vmatmul.mubr.msk.f32.vlgmr.msra.gmra.mxu1 %vm28_vm1, %v1173_v43 }
  0x84   :  { %v1477_v63 = vsub.f32 %v808_v58, %v808_v58  ;;  %1029 = vmatpush3.msra.mxu1 %v1214_v5  ;;  %1060 = vmatprep.mubr.f32.mxu1 %v132_v57  ;;  %v133_v0 = vsub.f32 %v131_v50, %v132_v57 }
  0x85   :  { %1030 = vmatprep.subr.mxu1 %v1216_v6 }
  0x86   :  { %1031 = vmatpush3.msra.mxu1 %v1216_v6  ;;  %v134_v1 = vand.u32 4294901760, %v133_v0  ;;  %v142_v8 = vand.u32 4294901760, %v1477_v63 }
  0x87   :  { %1032 = vmatprep.subr.mxu1 %v1218_v7 }
  0x88   :  { %1033 = vmatpush3.msra.mxu1 %v1218_v7  ;;  %955 = vmatprep.mubr.f32.mxu0 %v134_v1  ;;  %v143_v9 = vsub.f32 %v1477_v63, %v142_v8 }
  0x89   :  { %1034 = vmatprep.subr.mxu1 %v1232_v12 }
  0x8a   :  { %1035 = vmatpush3.msra.mxu1 %v1232_v12  ;;  %v144_v10 = vand.u32 4294901760, %v143_v9 }
  0x8b   :  { %1036 = vmatprep.subr.mxu1 %v1234_v13 }
  0x8c   :  { %1037 = vmatpush3.msra.mxu1 %v1234_v13  ;;  %956 = vmatmul.mubr.f32.vlgmr.msra.gmra.mxu0 %v144_v10 }
  0x8d   :  { %994 = vmatpush3.msra.mxu0 %v1245_v17  ;;  %1038 = vmatprep.subr.mxu1 %v1236_v14 }
  0x8e   :  { %995 = vmatprep.subr.mxu0 %v1248_v18  ;;  %1025 = vmatprep.mubr.f32.mxu0 %v131_v50 }
  0x8f   :  { %1039 = vmatpush3.msra.mxu1 %v1236_v14  ;;  %996 = vmatpush3.msra.mxu0 %v1248_v18 }
  0x90   :  { %1040 = vmatprep.subr.mxu1 %v1254_v20  ;;  %997 = vmatprep.subr.mxu0 %v1251_v19 }
  0x91   :  { %1041 = vmatpush3.msra.mxu1 %v1254_v20  ;;  %998 = vmatpush3.msra.mxu0 %v1251_v19 }
  0x92   :  { %1042 = vmatprep.subr.mxu1 %v1266_v24  ;;  %999 = vmatprep.subr.mxu0 %v1257_v21 }
  0x93   :  { %1043 = vmatpush3.msra.mxu1 %v1266_v24  ;;  %1000 = vmatpush3.msra.mxu0 %v1257_v21 }
  0x94   :  { %1044 = vmatprep.subr.mxu1 %v1326_v47  ;;  %1001 = vmatprep.subr.mxu0 %v1260_v22 }
  0x95   :  { %1045 = vmatpush3.msra.mxu1 %v1326_v47  ;;  %1002 = vmatpush3.msra.mxu0 %v1260_v22 }
  0x96   :  { %1046 = vmatprep.subr.mxu1 %v1329_v48  ;;  %1003 = vmatprep.subr.mxu0 %v1264_v23 }
  0x97   :  { %1047 = vmatpush3.msra.mxu1 %v1329_v48  ;;  %1004 = vmatpush3.msra.mxu0 %v1264_v23 }
  0x98   :  { %1048 = vmatprep.subr.mxu1 %v1331_v49  ;;  %1005 = vmatprep.subr.mxu0 %v1289_v31 }
  0x99   :  { %1049 = vmatpush3.msra.mxu1 %v1331_v49  ;;  %1006 = vmatpush3.msra.mxu0 %v1289_v31 }
  0x9a   :  { %1050 = vmatprep.subr.mxu1 %v1349_v56  ;;  %1007 = vmatprep.subr.mxu0 %v1303_v36 }
  0x9b   :  { %1051 = vmatpush3.msra.mxu1 %v1349_v56  ;;  %1008 = vmatpush3.msra.mxu0 %v1303_v36 }
  0x9c   :  { %1052 = vmatprep.subr.mxu1 %v1364_v62  ;;  %1009 = vmatprep.subr.mxu0 %v1343_v54 }
  0x9d   :  { %1053 = vmatpush3.msra.mxu1 %v1364_v62  ;;  %1010 = vmatpush3.msra.mxu0 %v1343_v54 }
  0x9e   :  { %1054 = vmatprep.subr.mxu1 %v1379_v4  ;;  %1011 = vmatprep.subr.mxu0 %v1346_v55 }
  0x9f   :  { %1055 = vmatpush3.msra.mxu1 %v1379_v4  ;;  %1012 = vmatpush3.msra.mxu0 %v1346_v55 }
  0xa0   :  { %1056 = vmatprep.subr.mxu1 %v1394_v16  ;;  %1013 = vmatprep.subr.mxu0 %v1361_v61 }
  0xa1   :  { %1057 = vmatpush3.msra.mxu1 %v1394_v16  ;;  %1014 = vmatpush3.msra.mxu0 %v1361_v61 }
  0xa2   :  { %1058 = vmatprep.subr.mxu1 %v1406_v37  ;;  %1015 = vmatprep.subr.mxu0 %v1376_v3 }
  0xa3   :  { %1059 = vmatpush3.msra.mxu1 %v1406_v37  ;;  %1016 = vmatpush3.msra.mxu0 %v1376_v3 }
  0xa4   :  { %1061 = vmatmul.mubr.f32.vlgmr.msra.gmra.mxu1 %v142_v8  ;;  %1098 = vmatprep.subr.mxu1 %v1214_v5 }
  0xa5   :  { %1017 = vmatprep.subr.mxu0 %v1391_v15  ;;  %1099 = vmatpush3.msra.mxu1 %v1214_v5 }
  0xa6   :  { %1130 = vmatprep.mubr.msk.f32.mxu1 %vm27_vm0, %v1173_v43  ;;  %1018 = vmatpush3.msra.mxu0 %v1391_v15 }
  0xa7   :  { %1100 = vmatprep.subr.mxu1 %v1216_v6  ;;  %1019 = vmatprep.subr.mxu0 %v1403_v34 }
  0xa8   :  { %1101 = vmatpush3.msra.mxu1 %v1216_v6  ;;  %1020 = vmatpush3.msra.mxu0 %v1403_v34 }
  0xa9   :  { %1102 = vmatprep.subr.mxu1 %v1218_v7  ;;  %1021 = vmatprep.subr.mxu0 %v1415_v41 }
  0xaa   :  { %1103 = vmatpush3.msra.mxu1 %v1218_v7  ;;  %1022 = vmatpush3.msra.mxu0 %v1415_v41 }
  0xab   :  { %1104 = vmatprep.subr.mxu1 %v1232_v12  ;;  %1023 = vmatprep.subr.mxu0 %v1425_v46 }
  0xac   :  { %1105 = vmatpush3.msra.mxu1 %v1232_v12  ;;  %1024 = vmatpush3.msra.mxu0 %v1425_v46 }
  0xad   :  { %1106 = vmatprep.subr.mxu1 %v1234_v13  ;;  %1026 = vmatmul.mubr.f32.vlgmr.msra.gmra.mxu0 %v1477_v63 }
  0xae   :  { %1063 = vmatprep.subr.mxu0 %v1269_v25  ;;  %1107 = vmatpush3.msra.mxu1 %v1234_v13 }
  0xaf   :  { %1064 = vmatpush3.msra.mxu0 %v1269_v25  ;;  %1095 = vmatprep.mubr.msk.f32.mxu0 %vm27_vm0, %v1173_v43 }
  0xb0   :  { %1108 = vmatprep.subr.mxu1 %v1236_v14  ;;  %1065 = vmatprep.subr.mxu0 %v1272_v26 }
  0xb1   :  { %1109 = vmatpush3.msra.mxu1 %v1236_v14  ;;  %1066 = vmatpush3.msra.mxu0 %v1272_v26 }
  0xb2   :  { %1110 = vmatprep.subr.mxu1 %v1254_v20  ;;  %1067 = vmatprep.subr.mxu0 %v1275_v27 }
  0xb3   :  { %1111 = vmatpush3.msra.mxu1 %v1254_v20  ;;  %1068 = vmatpush3.msra.mxu0 %v1275_v27 }
  0xb4   :  { %1112 = vmatprep.subr.mxu1 %v1266_v24  ;;  %1069 = vmatprep.subr.mxu0 %v1282_v29 }
  0xb5   :  { %1113 = vmatpush3.msra.mxu1 %v1266_v24  ;;  %1070 = vmatpush3.msra.mxu0 %v1282_v29 }
  0xb6   :  { %1114 = vmatprep.subr.mxu1 %v1326_v47  ;;  %1071 = vmatprep.subr.mxu0 %v1285_v30 }
  0xb7   :  { %1115 = vmatpush3.msra.mxu1 %v1326_v47  ;;  %1072 = vmatpush3.msra.mxu0 %v1285_v30 }
  0xb8   :  { %1116 = vmatprep.subr.mxu1 %v1329_v48  ;;  %1073 = vmatprep.subr.mxu0 %v1299_v35 }
  0xb9   :  { %1117 = vmatpush3.msra.mxu1 %v1329_v48  ;;  %1074 = vmatpush3.msra.mxu0 %v1299_v35 }
  0xba   :  { %1118 = vmatprep.subr.mxu1 %v1331_v49  ;;  %1075 = vmatprep.subr.mxu0 %v1320_v44 }
  0xbb   :  { %1119 = vmatpush3.msra.mxu1 %v1331_v49  ;;  %1076 = vmatpush3.msra.mxu0 %v1320_v44  ;;  %v756_v44 = vld [vmem:[%s1639_s1 + $0x8] sm:$0xff]  ;;  %s1174_s1 = smov [#allocation2]  }
  0xbc   :  { %1120 = vmatprep.subr.mxu1 %v1349_v56  ;;  %1077 = vmatprep.subr.mxu0 %v1336_v51  ;;  %s792_s27 = sshll.u32 %s1174_s1, 4  ;;  %s793_s27 = int_to_ptr.vmem [resolvable:$true] %s792_s27 }
  0xbd   :  { %1121 = vmatpush3.msra.mxu1 %v1349_v56  ;;  %1078 = vmatpush3.msra.mxu0 %v1336_v51  ;;  %s1149_s28 = scalar_lea.vmem %s793_s27, 256  ;;  %p1154_p1 = scmp.lt.s32.totalorder %s793_s27, %s793_s27 }
  0xbe   :  { %1122 = vmatprep.subr.mxu1 %v1364_v62  ;;  %1079 = vmatprep.subr.mxu0 %v1358_v60  ;;  %p1150_p0 = scmp.ne.s32.totalorder %s793_s27, %s1149_s28  ;;  %p1155_p2 = scmp.lt.s32.totalorder %s1149_s28, %s1149_s28 }
  0xbf   :  { %1123 = vmatpush3.msra.mxu1 %v1364_v62  ;;  %1080 = vmatpush3.msra.mxu0 %v1358_v60  ;;  %v759_v60 = vpop.permute.xlu0 %758 }
  0xc0   :  { %1124 = vmatprep.subr.mxu1 %v1379_v4  ;;  %1081 = vmatprep.subr.mxu0 %v1373_v2  ;;  %vm763_vm2 = vcmp.eq.s32.totalorder %v1453_v32, %v759_v60  ;;  %p1156_p3 = por %p1155_p2, %p1154_p1 }
  0xc1   :  { %1125 = vmatpush3.msra.mxu1 %v1379_v4  ;;  %1082 = vmatpush3.msra.mxu0 %v1373_v2 }
  0xc2   :  { %1126 = vmatprep.subr.mxu1 %v1394_v16  ;;  %1083 = vmatprep.subr.mxu0 %v1388_v11  ;;  %p1157_p4 = pnand %p1156_p3, %p1150_p0 }
  0xc3   :  { %1127 = vmatpush3.msra.mxu1 %v1394_v16  ;;  %1084 = vmatpush3.msra.mxu0 %v1388_v11 }
  0xc4   :  { %1128 = vmatprep.subr.mxu1 %v1406_v37  ;;  %1085 = vmatprep.subr.mxu0 %v1400_v33 }
  0xc5   :  { %1129 = vmatpush3.msra.mxu1 %v1406_v37  ;;  %1086 = vmatpush3.msra.mxu0 %v1400_v33 }
  0xc6   :  { %1131 = vmatmul.mubr.msk.f32.vlgmr.msra.gmra.mxu1 %vm28_vm1, %v1173_v43  ;;  %1087 = vmatprep.subr.mxu0 %v1412_v40 }
  0xc7   :  { %1088 = vmatpush3.msra.mxu0 %v1412_v40 }
  0xc8   :  { %1089 = vmatprep.subr.mxu0 %v1422_v45 }
  0xc9   :  { %1090 = vmatpush3.msra.mxu0 %v1422_v45 }
  0xca   :  { %1091 = vmatprep.subr.mxu0 %v1432_v53 }
  0xcb   :  { %1092 = vmatpush3.msra.mxu0 %v1432_v53 }
  0xcc   :  { %1093 = vmatprep.subr.mxu0 %v1439_v59 }
  0xcd   :  { %1094 = vmatpush3.msra.mxu0 %v1439_v59 }
  0xce   :  { %1096 = vmatmul.mubr.msk.f32.vlgmr.msra.gmra.mxu0 %vm28_vm1, %v1173_v43 }
 0x143   :  { %v992_v6 = vpop.f32.mrf.mxu1 }
 0x145   :  { %v297_v13 = vpop.f32.mrf.mxu1 }
 0x14c   :  { %v957_v5 = vpop.f32.mrf.mxu0 }
 0x14d   :  { %v304_v14 = vadd.f32 %v992_v6, %v957_v5 }
 0x14e   :  { %v136_v7 = vpop.f32.mrf.mxu0 }
 0x14f   :  { %v298_v19 = vadd.f32 %v297_v13, %v136_v7 }
 0x164   :  { %v1062_v17 = vpop.f32.mrf.mxu1 }
 0x166   :  { %v503_v22 = vpop.f32.mrf.mxu1 }
 0x16d   :  { %v1027_v12 = vpop.f32.mrf.mxu0 }
 0x16e   :  { %v415_v20 = vadd.f32 %v1027_v12, %v304_v14 }
 0x16f   :  { %v407_v18 = vpop.f32.mrf.mxu0 }
 0x170   :  { %v408_v21 = vadd.f32 %v407_v18, %v298_v19  ;;  %v512_v23 = vadd.f32 %v1062_v17, %v415_v20 }
 0x172   :  { %v504_v27 = vadd.f32 %v503_v22, %v408_v21 }
 0x186   :  { %v1132_v24 = vpop.f32.mrf.mxu1 }
 0x188   :  { %v723_v35 = vpop.f32.mrf.mxu1 }
 0x18e   :  { %v1097_v25 = vpop.f32.mrf.mxu0 }
 0x18f   :  { %v637_v26 = vadd.f32 %v1097_v25, %v512_v23 }
 0x190   :  { %v630_v29 = vpop.f32.mrf.mxu0 }
 0x191   :  { %v730_v30 = vadd.f32 %v1132_v24, %v637_v26  ;;  %v631_v31 = vadd.f32 %v630_v29, %v504_v27 }
 0x193   :  { %734 = vst [vmem:[#allocation2 + $0x8] sm:$0xff] %v730_v30  ;;  %v724_v36 = vadd.f32 %v723_v35, %v631_v31 }
 0x195   :  { %733 = vst [vmem:[#allocation2] sm:$0xff] %v724_v36  ;;  %735 = vmax.xlane.f32.xlu1 %v724_v36  ;;  %v765_v2 = vsel %vm763_vm2, %v724_v36, 0.0 }
 0x199   :  { %737 = vmax.xlane.f32.xlu1 %v730_v30 }
 0x1aa   :  { %761 = vperm.xlu1 %1140, %v756_v44  }
 0x21e   :  { %v736_v47 = vpop.xlane.xlu1 %735 }
 0x21f   :  { %v739_v48 = vsub.f32 %v724_v36, %v736_v47 }
 0x221   :  { %v741_v49 = vmul.f32 1.442695, %v739_v48 }
 0x222   :  { %v738_v51 = vpop.xlane.xlu1 %737 }
 0x223   :  { %1141 = vpow2.f32 %v741_v49  ;;  %v740_v54 = vsub.f32 %v730_v30, %v738_v51 }
 0x225   :  { %v743_v55 = vmul.f32 1.442695, %v740_v54 }
 0x226   :  { %v762_v61 = vpop.permute.xlu1 %761 }
 0x227   :  { %1143 = vpow2.f32 %v743_v55  ;;  %vm764_vm3 = vcmp.eq.s32.totalorder %v1453_v32, %v762_v61 }
 0x228   :  { %v766_v3 = vsel %vm764_vm3, %v730_v30, 0.0 }
 0x230   :  { %v1142_v56 = vpop.eup %1141 }
 0x231   :  { %745 = vadd.xlane.f32.xlu0 %v1142_v56 }
 0x234   :  { %v1144_v62 = vpop.eup %1143 }
 0x235   :  { %747 = vadd.xlane.f32.xlu1 %v1144_v62  ;;  %767 = vadd.xlane.f32.xlu0 %v765_v2 }
 0x239   :  { %769 = vadd.xlane.f32.xlu0 %v766_v3 }
 0x23a   :  { %1160 = shalt.err (!%p1157_p4)
}
 0x23b   :  { %s1175_s29 = smov 128   ;;  %s1176_s30 = smov 8   ;;  %vm784_vm4 = vcmask 7168  }
 0x23c   :  { %798 = dma.vmem_to_hbm [thread:$0]  %s793_s27, 256, %s1641_s3, [#allocation3], %s1175_s29, %s1175_s29, %s1176_s30  }
 0x2ba   :  { %v746_v4 = vpop.xlane.xlu0 %745 }
 0x2bb   :  { %1145 = vlog2.f32 %v746_v4 }
 0x2be   :  { %v748_v11 = vpop.xlane.xlu1 %747  ;;  %v768_v33 = vpop.xlane.xlu0 %767 }
 0x2bf   :  { %1147 = vlog2.f32 %v748_v11 }
 0x2c2   :  { %v770_v46 = vpop.xlane.xlu0 %769 }
 0x2c8   :  { %v1146_v15 = vpop.eup %1145 }
 0x2c9   :  { %v750_v16 = vmul.f32 0.6931472, %v1146_v15 }
 0x2cb   :  { %v753_v34 = vadd.f32 %v750_v16, %v736_v47 }
 0x2cc   :  { %v1148_v37 = vpop.eup %1147 }
 0x2cd   :  { %v752_v40 = vmul.f32 0.6931472, %v1148_v37  ;;  %v780_v41 = vsub.f32 %v753_v34, %v768_v33 }
 0x2cf   :  { %785 = vst.msk [vmem:[%s1642_s4] sm:$0xff] %vm784_vm4, %v780_v41  ;;  %v754_v45 = vadd.f32 %v752_v40, %v738_v51 }
 0x2d1   :  { %v781_v53 = vsub.f32 %v754_v45, %v770_v46 }
 0x2d3   :  { %786 = vst.msk [vmem:[%s1642_s4 + $0x8] sm:$0xff] %vm784_vm4, %v781_v53 }
 0x2d4   :  { %1169 = dma.done.wait [#allocation3], 256  }
 0x2d5   :  { %1170 = vsyncadd [#allocation3], 4294967040 }
 0x2d6   :  { %806 = vsyncpa [#allocation3], 1 }

</bundles_post_ra>
